<compile_context>
chip_gen: v6e
topology: v6e:2x2x1
jax: 0.10.0
libtpu: 0.0.40
codegen_flags: <defaults>
</compile_context>

<pallas_src>
import functools

import jax
import jax.numpy as jnp
from jax import lax
from jax.experimental import pallas as pl
from jax.experimental.pallas import tpu as pltpu


# --------------------------------------------------------------------------- #
# Kernel: recurrent part only (input projection is hoisted outside).
# --------------------------------------------------------------------------- #
def lstm_recurrent_kernel(zx_ref, h0_ref, c0_ref, w_rec_ref,
                          h_seq_ref, c_seq_ref, h_scr, c_scr, *, tc_unroll):
    """grid = (batch_tiles, T // Tc).  One grid step = Tc timesteps of a tile.

    zx_ref   : [Tc, TB, 4H] f32  hoisted x @ W_in^T + b (+1 folded into fg)
    h0_ref   : [TB, H]           initial hidden state (batch tile)
    c0_ref   : [TB, H]           initial cell state   (batch tile)
    w_rec_ref: [H, 4H]           recurrent weight, VMEM-resident (const index)
    h_seq_ref: [Tc, TB, H]       per-step hidden outputs
    c_seq_ref: [Tc, TB, H]       per-step cell outputs
    h_scr    : [TB, H] (weight dtype)  hidden carry across time chunks
    c_scr    : [TB, H] f32             cell carry across time chunks
    """
    chunk = pl.program_id(1)

    # Initialize the carried state at the first time chunk of each batch tile.
    @pl.when(chunk == 0)
    def _():
        h_scr[...] = h0_ref[...].astype(h_scr.dtype)
        c_scr[...] = c0_ref[...].astype(jnp.float32)

    H = c_scr.shape[1]
    Tc = zx_ref.shape[0]
    w_rec = w_rec_ref[...]                 # [H, 4H], resident for all steps

    def step(t, carry):
        h, c = carry                       # h: weight dtype, c: f32
        # z = z_x[t] + h @ W_rec^T   (bias and forget-gate +1 already in z_x)
        z = zx_ref[t].astype(jnp.float32)
        z += jnp.dot(h, w_rec, preferred_element_type=jnp.float32)

        i = z[:, 0 * H:1 * H]
        ig = z[:, 1 * H:2 * H]
        fg = z[:, 2 * H:3 * H]             # "+1.0" already folded into bias
        og = z[:, 3 * H:4 * H]

        new_c = c * jax.nn.sigmoid(fg) + jnp.tanh(i) * jax.nn.sigmoid(ig)
        new_h = jnp.tanh(new_c) * jax.nn.sigmoid(og)

        h_seq_ref[t] = new_h.astype(h_seq_ref.dtype)
        c_seq_ref[t] = new_c.astype(c_seq_ref.dtype)
        return new_h.astype(h_scr.dtype), new_c

    h, c = lax.fori_loop(0, Tc, step, (h_scr[...], c_scr[...]),
                         unroll=tc_unroll)
    h_scr[...] = h
    c_scr[...] = c


# --------------------------------------------------------------------------- #
# Parameter prep (ONE-TIME, not on the per-step path)
# --------------------------------------------------------------------------- #
def prepare_params(w_in, b_in, w_rec, compute_dtype=None):
    """Transpose weights once and fold the forget-gate +1.0 into the bias.

    w_in: [4H, I], b_in: [4H], w_rec: [4H, H]  (torch Linear layouts)
    Returns (w_in_t [I,4H], w_rec_t [H,4H], b2d [1,4H] f32).
    """
    H4 = w_in.shape[0]
    H = H4 // 4
    w_in_t = jnp.transpose(w_in)                    # [I, 4H]
    w_rec_t = jnp.transpose(w_rec)                  # [H, 4H]
    b = b_in.astype(jnp.float32).at[2 * H:3 * H].add(1.0).reshape(1, H4)
    if compute_dtype is not None:                   # e.g. jnp.bfloat16
        w_in_t = w_in_t.astype(compute_dtype)
        w_rec_t = w_rec_t.astype(compute_dtype)
    return w_in_t, w_rec_t, b


def input_projection(x_seq, params):
    """Hoisted z_x = x_seq @ W_in^T + b as ONE large matmul over [T*B, I]."""
    w_in_t, _, b2d = params
    T, B, I = x_seq.shape
    H4 = w_in_t.shape[1]
    prec = (jax.lax.Precision.HIGHEST
            if w_in_t.dtype == jnp.float32 else jax.lax.Precision.DEFAULT)
    x2d = x_seq.reshape(T * B, I).astype(w_in_t.dtype)
    z = jnp.dot(x2d, w_in_t, preferred_element_type=jnp.float32,
                precision=prec)
    return (z + b2d).reshape(T, B, H4)              # f32 [T, B, 4H]


# --------------------------------------------------------------------------- #
# Wrappers
# --------------------------------------------------------------------------- #
def lstm_sequence_forward(x_seq, h0, c0, params, *, block_b=None,
                          time_chunk=8):
    """Run T fused LSTM-cell steps with a VMEM-resident recurrent weight.

    x_seq: [T, B, I]; h0, c0: [B, H].  Returns (h_seq [T,B,H], c_seq [T,B,H]).
    """
    _, w_rec_t, _ = params
    T, B, _ = x_seq.shape
    H = h0.shape[1]
    H4 = 4 * H

    # Time-axis chunking: Tc timesteps per grid step (largest divisor of T
    # that does not exceed the requested chunk size).
    Tc = max(1, min(time_chunk, T))
    while T % Tc != 0:
        Tc -= 1
    n_tc = T // Tc

    # Batch tiling.
    if block_b is None:
        block_b = next((c for c in (256, 128, 64, 32, 16, 8) if B % c == 0), B)
        # v7x megacore: prefer >=2 batch tiles when the halved tile still
        # fills the MXU rows (>=128).  Harmless on 1-TC chips.
        if B == block_b and block_b >= 256 and (block_b // 2) % 128 == 0:
            block_b //= 2
    assert B % block_b == 0, "B must be divisible by block_b"
    nb = B // block_b

    # Hoisted input projection (one big GEMM, no recurrent dependency).
    z_x = input_projection(x_seq, params)           # [T, B, 4H] f32

    # VMEM accounting with a generation-aware cap.
    wbytes = jnp.dtype(w_rec_t.dtype).itemsize
    obytes = jnp.dtype(x_seq.dtype).itemsize
    need = (2 * H * H4 * wbytes                      # resident W_rec (2 bufs)
            + 2 * Tc * block_b * H4 * 4              # z_x double-buffer (f32)
            + 2 * 2 * Tc * block_b * H * obytes      # h/c output buffers
            + 2 * 2 * block_b * H * 4                # h0/c0 input buffers
            + block_b * H * (4 + wbytes))            # c (f32) + h carries
    try:
        vmem_cap = pltpu.get_tpu_info().vmem_capacity_bytes
    except Exception:
        vmem_cap = 64 << 20                          # v7x per-TC floor
    vmem_limit = int(min(max(2 * need, 4 << 20), int(0.65 * vmem_cap)))

    const = lambda nb_, tc_: (0, 0)                  # resident recurrent weight
    kernel = functools.partial(lstm_recurrent_kernel, tc_unroll=min(Tc, 8))

    return pl.pallas_call(
        kernel,
        out_shape=(
            jax.ShapeDtypeStruct((T, B, H), x_seq.dtype),   # h sequence
            jax.ShapeDtypeStruct((T, B, H), x_seq.dtype),   # c sequence
        ),
        grid_spec=pltpu.PrefetchScalarGridSpec(
            num_scalar_prefetch=0,
            grid=(nb, n_tc),
            in_specs=[
                pl.BlockSpec((Tc, block_b, H4),
                             lambda nb_, tc_: (tc_, nb_, 0)),          # z_x
                pl.BlockSpec((block_b, H), lambda nb_, tc_: (nb_, 0)),  # h0
                pl.BlockSpec((block_b, H), lambda nb_, tc_: (nb_, 0)),  # c0
                pl.BlockSpec((H, H4), const),                           # W_rec
            ],
            out_specs=[
                pl.BlockSpec((Tc, block_b, H),
                             lambda nb_, tc_: (tc_, nb_, 0)),
                pl.BlockSpec((Tc, block_b, H),
                             lambda nb_, tc_: (tc_, nb_, 0)),
            ],
            scratch_shapes=[
                pltpu.VMEM((block_b, H), w_rec_t.dtype),   # h carry
                pltpu.VMEM((block_b, H), jnp.float32),     # c carry
            ],
        ),
        compiler_params=pltpu.CompilerParams(
            dimension_semantics=("parallel", "arbitrary"),
            vmem_limit_bytes=vmem_limit,
        ),
    )(z_x, h0, c0, w_rec_t)


def lstm_cell_forward(x, h, c, params):
    """Single-step LSTMCell forward (matches the PyTorch module)."""
    h_seq, c_seq = lstm_sequence_forward(x[None], h, c, params, time_chunk=1)
    return h_seq[0], c_seq[0]


# --------------------------------------------------------------------------- #
# Reference + init helpers
# --------------------------------------------------------------------------- #
def _xavier_uniform(key, shape):
    fan_out, fan_in = shape
    limit = jnp.sqrt(6.0 / (fan_in + fan_out))
    return jax.random.uniform(key, shape, jnp.float32, -limit, limit)


def _orthogonal(key, shape):
    rows, cols = shape
    n = max(rows, cols)
    a = jax.random.normal(key, (n, n), jnp.float32)
    q, r = jnp.linalg.qr(a)
    q = q * jnp.sign(jnp.diag(r))[None, :]
    return q[:rows, :cols]


def reference_step(x, h, c, w_in, b_in, w_rec):
    hi = jax.lax.Precision.HIGHEST
    z = (jnp.dot(x, w_in.T, precision=hi) + b_in[None, :]
         + jnp.dot(h, w_rec.T, precision=hi))
    H = h.shape[1]
    i, ig, fg, og = (z[:, k * H:(k + 1) * H] for k in range(4))
    new_c = c * jax.nn.sigmoid(fg + 1.0) + jnp.tanh(i) * jax.nn.sigmoid(ig)
    new_h = jnp.tanh(new_c) * jax.nn.sigmoid(og)
    return new_h, new_c


# --------------------------------------------------------------------------- #
# Demo / correctness check
# --------------------------------------------------------------------------- #
if __name__ == "__main__":
    # H multiple of 128 -> lane-aligned gate slabs; B multiple of 8 sublanes.
    # T=16 with time_chunk=8 exercises the carry across time chunks.
    B, I, H, T = 8, 64, 128, 16

    key = jax.random.PRNGKey(0)
    kx, kh, kc, kw1, kb1, kw2 = jax.random.split(key, 6)

    x_seq = jax.random.normal(kx, (T, B, I), jnp.float32)
    h0 = jax.random.normal(kh, (B, H), jnp.float32)
    c0 = jax.random.normal(kc, (B, H), jnp.float32)

    # Deterministic parameter init mirroring LSTMCell.init_weights():
    w_in = _xavier_uniform(kw1, (4 * H, I))                           # input_map.weight
    b_in = jax.random.uniform(kb1, (4 * H,), jnp.float32, -0.1, 0.1)  # input_map.bias
    w_rec = _orthogonal(kw2, (4 * H, H))                              # recurrent_map.weight

    # One-time parameter prep (transpose + bias fold). Not on the step path.
    params = prepare_params(w_in, b_in, w_rec)

    # 1) Single-step cell == the PyTorch module's forward.
    new_h, new_c = lstm_cell_forward(x_seq[0], h0, c0, params)
    jax.block_until_ready((new_h, new_c))
    ref_h, ref_c = reference_step(x_seq[0], h0, c0, w_in, b_in, w_rec)
    assert jnp.allclose(new_h, ref_h, atol=1e-4, rtol=1e-4)
    assert jnp.allclose(new_c, ref_c, atol=1e-4, rtol=1e-4)

    # 2) Fused multi-step run (f32): hoisted input projection + Tc-chunked
    #    recurrence with VMEM-resident recurrent weight.
    h_seq, c_seq = lstm_sequence_forward(x_seq, h0, c0, params, time_chunk=8)
    jax.block_until_ready((h_seq, c_seq))
    rh, rc = h0, c0
    for t in range(T):
        rh, rc = reference_step(x_seq[t], rh, rc, w_in, b_in, w_rec)
        assert jnp.allclose(h_seq[t], rh, atol=1e-4, rtol=1e-4)
        assert jnp.allclose(c_seq[t], rc, atol=1e-4, rtol=1e-4)

    # 3) bf16-weight path smoke test (native MXU dtype; looser tolerance).
    params_bf16 = prepare_params(w_in, b_in, w_rec, compute_dtype=jnp.bfloat16)
    h_bf, c_bf = lstm_sequence_forward(x_seq, h0, c0, params_bf16,
                                       time_chunk=8)
    jax.block_until_ready((h_bf, c_bf))
    assert bool(jnp.all(jnp.isfinite(h_bf))) and bool(jnp.all(jnp.isfinite(c_bf)))
    assert float(jnp.max(jnp.abs(h_bf - h_seq))) < 0.15  # h is tanh-bounded

    print("KERNEL_OK")
</pallas_src>

<mosaic_0001>
module attributes {stable_mosaic.version = 11 : i64} {
  func.func @lstm_recurrent_kernel(%arg0: i32, %arg1: i32, %arg2: memref<1x8x512xf32, #tpu.memory_space<vmem>>, %arg3: memref<8x128xf32, #tpu.memory_space<vmem>>, %arg4: memref<8x128xf32, #tpu.memory_space<vmem>>, %arg5: memref<128x512xf32, #tpu.memory_space<vmem>>, %arg6: memref<1x8x128xf32, #tpu.memory_space<vmem>>, %arg7: memref<1x8x128xf32, #tpu.memory_space<vmem>>, %arg8: memref<8x128xf32, #tpu.memory_space<vmem>>, %arg9: memref<8x128xf32, #tpu.memory_space<vmem>>) attributes {dimension_semantics = [#tpu.dimension_semantics<parallel>, #tpu.dimension_semantics<arbitrary>], iteration_bounds = array<i64: 1, 1>, scalar_prefetch = 0 : i64, scratch_operands = 2 : i64, tpu.core_type = #tpu.core_type<tc>, window_params = [{transform_indices = @transform_0, window_bounds = array<i64: 1, 8, 512>}, {transform_indices = @transform_1, window_bounds = array<i64: 8, 128>}, {transform_indices = @transform_2, window_bounds = array<i64: 8, 128>}, {pipeline_mode = #tpu.pipeline_mode<synchronous>, transform_indices = @transform_3, window_bounds = array<i64: 128, 512>}, {transform_indices = @transform_4, window_bounds = array<i64: 1, 8, 128>}, {transform_indices = @transform_5, window_bounds = array<i64: 1, 8, 128>}]} {
    %c0_i32 = arith.constant 0 : i32
    %0 = arith.cmpi eq, %arg1, %c0_i32 : i32
    %1 = arith.extui %0 : i1 to i32
    %c0_i32_0 = arith.constant 0 : i32
    %2 = arith.cmpi ne, %1, %c0_i32_0 : i32
    scf.if %2 {
      %c0_20 = arith.constant 0 : index
      %c0_21 = arith.constant 0 : index
      %46 = vector.load %arg3[%c0_20, %c0_21] : memref<8x128xf32, #tpu.memory_space<vmem>>, vector<8x128xf32>
      %c0_22 = arith.constant 0 : index
      %c0_23 = arith.constant 0 : index
      %47 = vector.load %arg8[%c0_22, %c0_23] : memref<8x128xf32, #tpu.memory_space<vmem>>, vector<8x128xf32>
      tpu.vector_store %arg8[%c0_22, %c0_23], %46 {strides = array<i32>} : memref<8x128xf32, #tpu.memory_space<vmem>>, vector<8x128xf32>,
      %c0_24 = arith.constant 0 : index
      %c0_25 = arith.constant 0 : index
      %48 = vector.load %arg4[%c0_24, %c0_25] : memref<8x128xf32, #tpu.memory_space<vmem>>, vector<8x128xf32>
      %c0_26 = arith.constant 0 : index
      %c0_27 = arith.constant 0 : index
      %49 = vector.load %arg9[%c0_26, %c0_27] : memref<8x128xf32, #tpu.memory_space<vmem>>, vector<8x128xf32>
      tpu.vector_store %arg9[%c0_26, %c0_27], %48 {strides = array<i32>} : memref<8x128xf32, #tpu.memory_space<vmem>>, vector<8x128xf32>,
    } else {
    }
    %c0 = arith.constant 0 : index
    %c0_1 = arith.constant 0 : index
    %3 = vector.load %arg5[%c0, %c0_1] : memref<128x512xf32, #tpu.memory_space<vmem>>, vector<128x512xf32>
    %c0_2 = arith.constant 0 : index
    %c0_3 = arith.constant 0 : index
    %4 = vector.load %arg8[%c0_2, %c0_3] : memref<8x128xf32, #tpu.memory_space<vmem>>, vector<8x128xf32>
    %c0_4 = arith.constant 0 : index
    %c0_5 = arith.constant 0 : index
    %5 = vector.load %arg9[%c0_4, %c0_5] : memref<8x128xf32, #tpu.memory_space<vmem>>, vector<8x128xf32>
    %c0_i32_6 = arith.constant 0 : i32
    %6 = arith.index_cast %c0_i32_6 : i32 to index
    %c0_7 = arith.constant 0 : index
    %c0_8 = arith.constant 0 : index
    %7 = vector.load %arg2[%6, %c0_7, %c0_8] : memref<1x8x512xf32, #tpu.memory_space<vmem>>, vector<1x8x512xf32>
    %8 = vector.shape_cast %7 : vector<1x8x512xf32> to vector<8x512xf32>
    %cst = arith.constant dense<0.000000e+00> : vector<8x512xf32>
    %9 = tpu.matmul %4, %3, %cst {dimension_numbers = #tpu.dot_dimension_numbers<[1], [0], [0], [1], [0, 0, 1, 1], [], []>} : vector<8x128xf32>, vector<128x512xf32>, vector<8x512xf32> -> vector<8x512xf32>
    %10 = arith.addf %8, %9 : vector<8x512xf32>
    %11 = vector.extract_strided_slice %10 {offsets = [0, 0], sizes = [8, 128], strides = [1, 1]} : vector<8x512xf32> to vector<8x128xf32>
    %12 = vector.extract_strided_slice %10 {offsets = [0, 128], sizes = [8, 128], strides = [1, 1]} : vector<8x512xf32> to vector<8x128xf32>
    %13 = vector.extract_strided_slice %10 {offsets = [0, 256], sizes = [8, 128], strides = [1, 1]} : vector<8x512xf32> to vector<8x128xf32>
    %14 = vector.extract_strided_slice %10 {offsets = [0, 384], sizes = [8, 128], strides = [1, 1]} : vector<8x512xf32> to vector<8x128xf32>
    %15 = arith.negf %13 : vector<8x128xf32>
    %16 = math.exp %15 : vector<8x128xf32>
    %cst_9 = arith.constant 1.000000e+00 : f32
    %17 = vector.broadcast %cst_9 : f32 to vector<8x128xf32>
    %18 = arith.addf %17, %16 : vector<8x128xf32>
    %19 = arith.divf %17, %18 : vector<8x128xf32>
    %20 = arith.mulf %5, %19 : vector<8x128xf32>
    %21 = math.tanh %11 : vector<8x128xf32>
    %22 = arith.negf %12 : vector<8x128xf32>
    %23 = math.exp %22 : vector<8x128xf32>
    %cst_10 = arith.constant 1.000000e+00 : f32
    %24 = vector.broadcast %cst_10 : f32 to vector<8x128xf32>
    %25 = arith.addf %24, %23 : vector<8x128xf32>
    %26 = arith.divf %24, %25 : vector<8x128xf32>
    %27 = arith.mulf %21, %26 : vector<8x128xf32>
    %28 = arith.addf %20, %27 : vector<8x128xf32>
    %29 = math.tanh %28 : vector<8x128xf32>
    %30 = arith.negf %14 : vector<8x128xf32>
    %31 = math.exp %30 : vector<8x128xf32>
    %cst_11 = arith.constant 1.000000e+00 : f32
    %32 = vector.broadcast %cst_11 : f32 to vector<8x128xf32>
    %33 = arith.addf %32, %31 : vector<8x128xf32>
    %34 = arith.divf %32, %33 : vector<8x128xf32>
    %35 = arith.mulf %29, %34 : vector<8x128xf32>
    %36 = arith.index_cast %c0_i32_6 : i32 to index
    %c0_12 = arith.constant 0 : index
    %c0_13 = arith.constant 0 : index
    %37 = vector.load %arg6[%36, %c0_12, %c0_13] : memref<1x8x128xf32, #tpu.memory_space<vmem>>, vector<1x8x128xf32>
    %38 = vector.shape_cast %37 : vector<1x8x128xf32> to vector<8x128xf32>
    %39 = vector.shape_cast %35 : vector<8x128xf32> to vector<1x8x128xf32>
    tpu.vector_store %arg6[%36, %c0_12, %c0_13], %39 {strides = array<i32>} : memref<1x8x128xf32, #tpu.memory_space<vmem>>, vector<1x8x128xf32>,
    %40 = arith.index_cast %c0_i32_6 : i32 to index
    %c0_14 = arith.constant 0 : index
    %c0_15 = arith.constant 0 : index
    %41 = vector.load %arg7[%40, %c0_14, %c0_15] : memref<1x8x128xf32, #tpu.memory_space<vmem>>, vector<1x8x128xf32>
    %42 = vector.shape_cast %41 : vector<1x8x128xf32> to vector<8x128xf32>
    %43 = vector.shape_cast %28 : vector<8x128xf32> to vector<1x8x128xf32>
    tpu.vector_store %arg7[%40, %c0_14, %c0_15], %43 {strides = array<i32>} : memref<1x8x128xf32, #tpu.memory_space<vmem>>, vector<1x8x128xf32>,
    %c1_i32 = arith.constant 1 : i32
    %c0_16 = arith.constant 0 : index
    %c0_17 = arith.constant 0 : index
    %44 = vector.load %arg8[%c0_16, %c0_17] : memref<8x128xf32, #tpu.memory_space<vmem>>, vector<8x128xf32>
    tpu.vector_store %arg8[%c0_16, %c0_17], %35 {strides = array<i32>} : memref<8x128xf32, #tpu.memory_space<vmem>>, vector<8x128xf32>,
    %c0_18 = arith.constant 0 : index
    %c0_19 = arith.constant 0 : index
    %45 = vector.load %arg9[%c0_18, %c0_19] : memref<8x128xf32, #tpu.memory_space<vmem>>, vector<8x128xf32>
    tpu.vector_store %arg9[%c0_18, %c0_19], %28 {strides = array<i32>} : memref<8x128xf32, #tpu.memory_space<vmem>>, vector<8x128xf32>,
    return
  }
  func.func @transform_0(%arg0: i32, %arg1: i32) -> (i32, i32, i32) {
    %c0_i32 = arith.constant 0 : i32
    %c0_i32_0 = arith.constant 0 : i32
    return %arg1, %arg0, %c0_i32 : i32, i32, i32
  }
  func.func @transform_1(%arg0: i32, %arg1: i32) -> (i32, i32) {
    %c0_i32 = arith.constant 0 : i32
    %c0_i32_0 = arith.constant 0 : i32
    return %arg0, %c0_i32 : i32, i32
  }
  func.func @transform_2(%arg0: i32, %arg1: i32) -> (i32, i32) {
    %c0_i32 = arith.constant 0 : i32
    %c0_i32_0 = arith.constant 0 : i32
    return %arg0, %c0_i32 : i32, i32
  }
  func.func @transform_3(%arg0: i32, %arg1: i32) -> (i32, i32) {
    %c0_i32 = arith.constant 0 : i32
    %c0_i32_0 = arith.constant 0 : i32
    %c0_i32_1 = arith.constant 0 : i32
    return %c0_i32, %c0_i32_0 : i32, i32
  }
  func.func @transform_4(%arg0: i32, %arg1: i32) -> (i32, i32, i32) {
    %c0_i32 = arith.constant 0 : i32
    %c0_i32_0 = arith.constant 0 : i32
    return %arg1, %arg0, %c0_i32 : i32, i32, i32
  }
  func.func @transform_5(%arg0: i32, %arg1: i32) -> (i32, i32, i32) {
    %c0_i32 = arith.constant 0 : i32
    %c0_i32_0 = arith.constant 0 : i32
    return %arg1, %arg0, %c0_i32 : i32, i32, i32
  }
}

</mosaic_0001>

<bundles_post_ra>
// kernel: tpu_custom_call.1
= control target key start
LH: loop header
LB: loop body
LE: loop exit
PB: predicated region body
PF: predicated region fallthrough
CT: control target
= control target key end

     0   :  { %11 = vsyncpa [#allocation5], 0  ;;  %s568_s0 = inlined_call_operand.hbm [shape: f32[1,8,512], index: 0, kind: input, shape index: {}]   ;;  %s569_s1 = inlined_call_operand.hbm [shape: f32[8,128], index: 1, kind: input, shape index: {}]   ;;  %s570_s2 = inlined_call_operand.hbm [shape: f32[8,128], index: 2, kind: input, shape index: {}]   ;;  %s571_s3 = inlined_call_operand.hbm [shape: f32[128,512], index: 3, kind: input, shape index: {}]   ;;  %s572_s4 = inlined_call_operand.hbm [shape: f32[1,8,128], index: 4, kind: output, shape index: {0}]   ;;  %s573_s5 = inlined_call_operand.hbm [shape: f32[1,8,128], index: 5, kind: output, shape index: {1}]  }
   0x1   :  { %12 = vsyncpa [#allocation8], 0 }
   0x2   :  { %13 = vsyncpa [#allocation11], 0 }
   0x3   :  { %14 = vsyncpa [#allocation6], 0 }
   0x4   :  { %15 = vsyncpa [#allocation14], 0  ;;  %s511_s18 = smov [#allocation7]   ;;  %s512_s20 = smov [#allocation4]  }
   0x5   :  { %s32_s19 = sshll.u32 %s511_s18, 4  ;;  %s22_s21 = sshll.u32 %s512_s20, 4  ;;  %s33_s19 = int_to_ptr.vmem [resolvable:$true] %s32_s19  ;;  %s23_s21 = int_to_ptr.vmem [resolvable:$true] %s22_s21 }
   0x6   :  { %s389_s22 = scalar_lea.vmem %s33_s19, 128  ;;  %p394_p1 = scmp.lt.s32.totalorder %s33_s19, %s33_s19 }
   0x7   :  { %p390_p0 = scmp.ne.s32.totalorder %s33_s19, %s389_s22  ;;  %p395_p2 = scmp.lt.s32.totalorder %s389_s22, %s389_s22 }
   0x9   :  { %p396_p3 = por %p395_p2, %p394_p1 }
   0xb   :  { %p397_p4 = pnand %p396_p3, %p390_p0 }
   0xd   :  { %400 = shalt.err (!%p397_p4)
}
   0xe   :  { %35 = dma.hbm_to_vmem [thread:$0]  %s569_s1, 128, %s33_s19, [#allocation8]  }
   0xf   :  { %s409_s25 = scalar_lea.vmem %s23_s21, 512  ;;  %p414_p6 = scmp.lt.s32.totalorder %s23_s21, %s23_s21 }
  0x10   :  { %p410_p5 = scmp.ne.s32.totalorder %s23_s21, %s409_s25  ;;  %p415_p7 = scmp.lt.s32.totalorder %s409_s25, %s409_s25 }
  0x12   :  { %p416_p8 = por %p415_p7, %p414_p6 }
  0x14   :  { %p417_p9 = pnand %p416_p8, %p410_p5 }
  0x16   :  { %420 = shalt.err (!%p417_p9)
}
  0x17   :  { %25 = dma.hbm_to_vmem [thread:$0]  %s568_s0, 512, %s23_s21, [#allocation5]  }
  0x18   :  { %s513_s28 = smov [#allocation9]   ;;  %s514_s30 = smov [#allocation10]  }
  0x19   :  { %s42_s29 = sshll.u32 %s513_s28, 4  ;;  %s51_s6 = sshll.u32 %s514_s30, 4  ;;  %s43_s29 = int_to_ptr.vmem [resolvable:$true] %s42_s29  ;;  %s52_s6 = int_to_ptr.vmem [resolvable:$true] %s51_s6 }
  0x1a   :  { %s429_s7 = scalar_lea.vmem %s43_s29, 128  ;;  %p434_p11 = scmp.lt.s32.totalorder %s43_s29, %s43_s29 }
  0x1b   :  { %p430_p10 = scmp.ne.s32.totalorder %s43_s29, %s429_s7  ;;  %p435_p12 = scmp.lt.s32.totalorder %s429_s7, %s429_s7 }
  0x1d   :  { %p436_p13 = por %p435_p12, %p434_p11 }
  0x1f   :  { %p437_p0 = pnand %p436_p13, %p430_p10 }
  0x21   :  { %440 = shalt.err (!%p437_p0)
}
  0x22   :  { %45 = dma.hbm_to_vmem [thread:$0]  %s570_s2, 128, %s43_s29, [#allocation8]  }
  0x23   :  { %s449_s9 = scalar_lea.vmem %s52_s6, 8192  ;;  %p454_p2 = scmp.lt.s32.totalorder %s52_s6, %s52_s6 }
  0x24   :  { %p450_p1 = scmp.ne.s32.totalorder %s52_s6, %s449_s9  ;;  %p455_p3 = scmp.lt.s32.totalorder %s449_s9, %s449_s9 }
  0x26   :  { %p456_p4 = por %p455_p3, %p454_p2 }
  0x28   :  { %p457_p5 = pnand %p456_p4, %p450_p1 }
  0x2a   :  { %460 = shalt.err (!%p457_p5)
}
  0x2b   :  { %s515_s0 = smov 512   ;;  %s516_s10 = smov 32  }
  0x2c   :  { %57 = dma.hbm_to_vmem [thread:$0]  %s571_s3, 8192, %s52_s6, [#allocation11], %s515_s0, %s515_s0, %s516_s10  }
  0x2d   :  { %501 = dma.done.wait [#allocation5], 512  }
  0x2e   :  { %502 = vsyncadd [#allocation5], 4294966784 }
  0x2f   :  { %503 = dma.done.wait [#allocation8], 256  }
  0x30   :  { %504 = vsyncadd [#allocation8], 4294967040 }
  0x31   :  { %505 = dma.done.wait [#allocation11], 8192  }
  0x32   :  { %506 = vsyncadd [#allocation11], 4294959104  ;;  %v517_v0 = vmov 0.0   ;;  %v139_v1 = vld [vmem:[#allocation10 + $0x1e8] sm:$0xff]  ;;  %v141_v2 = vld [vmem:[#allocation10 + $0x1f8] sm:$0xff]  ;;  %s518_s2 = smov [#allocation13]  }
  0x33   :  { %212 = vmatprep.mubr.f32.mxu0 %v517_v0  ;;  %283 = vmatprep.mubr.f32.mxu1 %v517_v0  ;;  %v138_v3 = vld [vmem:[#allocation10 + $0x1e0] sm:$0xff]  ;;  %v140_v4 = vld [vmem:[#allocation10 + $0x1f0] sm:$0xff]  ;;  %v135_v5 = vld [vmem:[#allocation10 + $0x1c8] sm:$0xff]  ;;  %s338_s3 = sshll.u32 %s518_s2, 4  ;;  %s339_s3 = int_to_ptr.vmem [resolvable:$true] %s338_s3 }
  0x34   :  { %148 = vmatprep.subr.mxu0 %v139_v1  ;;  %219 = vmatprep.subr.mxu1 %v141_v2  ;;  %v137_v6 = vld [vmem:[#allocation10 + $0x1d8] sm:$0xff]  ;;  %v134_v7 = vld [vmem:[#allocation10 + $0x1c0] sm:$0xff]  ;;  %v136_v8 = vld [vmem:[#allocation10 + $0x1d0] sm:$0xff]  ;;  %s461_s13 = scalar_lea.vmem %s339_s3, 128  ;;  %p466_p7 = scmp.lt.s32.totalorder %s339_s3, %s339_s3 }
  0x35   :  { %149 = vmatpush1.msra.mxu0 %v138_v3  ;;  %220 = vmatpush1.msra.mxu1 %v140_v4  ;;  %v131_v9 = vld [vmem:[#allocation10 + $0x1a8] sm:$0xff]  ;;  %v133_v10 = vld [vmem:[#allocation10 + $0x1b8] sm:$0xff]  ;;  %v130_v11 = vld [vmem:[#allocation10 + $0x1a0] sm:$0xff]  ;;  %p462_p6 = scmp.ne.s32.totalorder %s339_s3, %s461_s13  ;;  %p467_p8 = scmp.lt.s32.totalorder %s461_s13, %s461_s13 }
  0x36   :  { %150 = vmatprep.subr.mxu0 %v135_v5  ;;  %221 = vmatprep.subr.mxu1 %v137_v6  ;;  %v132_v12 = vld [vmem:[#allocation10 + $0x1b0] sm:$0xff]  ;;  %v127_v13 = vld [vmem:[#allocation10 + $0x188] sm:$0xff]  ;;  %v129_v14 = vld [vmem:[#allocation10 + $0x198] sm:$0xff] }
  0x37   :  { %151 = vmatpush1.msra.mxu0 %v134_v7  ;;  %222 = vmatpush1.msra.mxu1 %v136_v8  ;;  %v126_v15 = vld [vmem:[#allocation10 + $0x180] sm:$0xff]  ;;  %v128_v16 = vld [vmem:[#allocation10 + $0x190] sm:$0xff]  ;;  %v123_v17 = vld [vmem:[#allocation10 + $0x168] sm:$0xff]  ;;  %p468_p9 = por %p467_p8, %p466_p7 }
  0x38   :  { %152 = vmatprep.subr.mxu0 %v131_v9  ;;  %223 = vmatprep.subr.mxu1 %v133_v10  ;;  %v125_v18 = vld [vmem:[#allocation10 + $0x178] sm:$0xff]  ;;  %v122_v19 = vld [vmem:[#allocation10 + $0x160] sm:$0xff]  ;;  %v124_v20 = vld [vmem:[#allocation10 + $0x170] sm:$0xff] }
  0x39   :  { %153 = vmatpush1.msra.mxu0 %v130_v11  ;;  %224 = vmatpush1.msra.mxu1 %v132_v12  ;;  %v119_v21 = vld [vmem:[#allocation10 + $0x148] sm:$0xff]  ;;  %v121_v22 = vld [vmem:[#allocation10 + $0x158] sm:$0xff]  ;;  %v118_v23 = vld [vmem:[#allocation10 + $0x140] sm:$0xff]  ;;  %p469_p10 = pnand %p468_p9, %p462_p6 }
  0x3a   :  { %154 = vmatprep.subr.mxu0 %v127_v13  ;;  %225 = vmatprep.subr.mxu1 %v129_v14  ;;  %v120_v24 = vld [vmem:[#allocation10 + $0x150] sm:$0xff]  ;;  %v115_v25 = vld [vmem:[#allocation10 + $0x128] sm:$0xff]  ;;  %v117_v26 = vld [vmem:[#allocation10 + $0x138] sm:$0xff] }
  0x3b   :  { %155 = vmatpush1.msra.mxu0 %v126_v15  ;;  %226 = vmatpush1.msra.mxu1 %v128_v16  ;;  %v114_v27 = vld [vmem:[#allocation10 + $0x120] sm:$0xff]  ;;  %v116_v28 = vld [vmem:[#allocation10 + $0x130] sm:$0xff]  ;;  %v111_v29 = vld [vmem:[#allocation10 + $0x108] sm:$0xff] }
  0x3c   :  { %156 = vmatprep.subr.mxu0 %v123_v17  ;;  %227 = vmatprep.subr.mxu1 %v125_v18  ;;  %v113_v30 = vld [vmem:[#allocation10 + $0x118] sm:$0xff]  ;;  %v110_v31 = vld [vmem:[#allocation10 + $0x100] sm:$0xff]  ;;  %v112_v32 = vld [vmem:[#allocation10 + $0x110] sm:$0xff] }
  0x3d   :  { %157 = vmatpush1.msra.mxu0 %v122_v19  ;;  %228 = vmatpush1.msra.mxu1 %v124_v20  ;;  %v107_v33 = vld [vmem:[#allocation10 + $0xe8] sm:$0xff]  ;;  %v109_v34 = vld [vmem:[#allocation10 + $0xf8] sm:$0xff]  ;;  %v106_v35 = vld [vmem:[#allocation10 + $0xe0] sm:$0xff] }
  0x3e   :  { %158 = vmatprep.subr.mxu0 %v119_v21  ;;  %229 = vmatprep.subr.mxu1 %v121_v22  ;;  %v108_v36 = vld [vmem:[#allocation10 + $0xf0] sm:$0xff]  ;;  %v103_v37 = vld [vmem:[#allocation10 + $0xc8] sm:$0xff]  ;;  %v105_v38 = vld [vmem:[#allocation10 + $0xd8] sm:$0xff] }
  0x3f   :  { %159 = vmatpush1.msra.mxu0 %v118_v23  ;;  %230 = vmatpush1.msra.mxu1 %v120_v24  ;;  %v102_v39 = vld [vmem:[#allocation10 + $0xc0] sm:$0xff]  ;;  %v104_v40 = vld [vmem:[#allocation10 + $0xd0] sm:$0xff]  ;;  %v99_v41 = vld [vmem:[#allocation10 + $0xa8] sm:$0xff] }
  0x40   :  { %160 = vmatprep.subr.mxu0 %v115_v25  ;;  %231 = vmatprep.subr.mxu1 %v117_v26  ;;  %v101_v42 = vld [vmem:[#allocation10 + $0xb8] sm:$0xff]  ;;  %v98_v43 = vld [vmem:[#allocation10 + $0xa0] sm:$0xff]  ;;  %v100_v44 = vld [vmem:[#allocation10 + $0xb0] sm:$0xff] }
  0x41   :  { %161 = vmatpush1.msra.mxu0 %v114_v27  ;;  %232 = vmatpush1.msra.mxu1 %v116_v28  ;;  %v95_v45 = vld [vmem:[#allocation10 + $0x88] sm:$0xff]  ;;  %v97_v46 = vld [vmem:[#allocation10 + $0x98] sm:$0xff]  ;;  %v94_v47 = vld [vmem:[#allocation10 + $0x80] sm:$0xff] }
  0x42   :  { %162 = vmatprep.subr.mxu0 %v111_v29  ;;  %233 = vmatprep.subr.mxu1 %v113_v30  ;;  %v96_v48 = vld [vmem:[#allocation10 + $0x90] sm:$0xff]  ;;  %v91_v49 = vld [vmem:[#allocation10 + $0x68] sm:$0xff]  ;;  %v93_v50 = vld [vmem:[#allocation10 + $0x78] sm:$0xff] }
  0x43   :  { %163 = vmatpush1.msra.mxu0 %v110_v31  ;;  %234 = vmatpush1.msra.mxu1 %v112_v32  ;;  %v90_v51 = vld [vmem:[#allocation10 + $0x60] sm:$0xff]  ;;  %v92_v52 = vld [vmem:[#allocation10 + $0x70] sm:$0xff]  ;;  %v87_v53 = vld [vmem:[#allocation10 + $0x48] sm:$0xff] }
  0x44   :  { %164 = vmatprep.subr.mxu0 %v107_v33  ;;  %235 = vmatprep.subr.mxu1 %v109_v34  ;;  %v89_v54 = vld [vmem:[#allocation10 + $0x58] sm:$0xff]  ;;  %v86_v55 = vld [vmem:[#allocation10 + $0x40] sm:$0xff]  ;;  %v88_v56 = vld [vmem:[#allocation10 + $0x50] sm:$0xff] }
  0x45   :  { %165 = vmatpush1.msra.mxu0 %v106_v35  ;;  %236 = vmatpush1.msra.mxu1 %v108_v36  ;;  %v83_v57 = vld [vmem:[#allocation10 + $0x28] sm:$0xff]  ;;  %v85_v58 = vld [vmem:[#allocation10 + $0x38] sm:$0xff]  ;;  %v82_v59 = vld [vmem:[#allocation10 + $0x20] sm:$0xff] }
  0x46   :  { %166 = vmatprep.subr.mxu0 %v103_v37  ;;  %237 = vmatprep.subr.mxu1 %v105_v38  ;;  %v84_v60 = vld [vmem:[#allocation10 + $0x30] sm:$0xff]  ;;  %v79_v61 = vld [vmem:[#allocation10 + $0x8] sm:$0xff]  ;;  %v81_v62 = vld [vmem:[#allocation10 + $0x18] sm:$0xff] }
  0x47   :  { %167 = vmatpush1.msra.mxu0 %v102_v39  ;;  %238 = vmatpush1.msra.mxu1 %v104_v40  ;;  %v78_v63 = vld [vmem:[#allocation10] sm:$0xff]  ;;  %v80_v0 = vld [vmem:[#allocation10 + $0x10] sm:$0xff]  ;;  %v145_v5 = vld [vmem:[#allocation4 + $0x8] sm:$0xff] }
  0x48   :  { %168 = vmatprep.subr.mxu0 %v99_v41  ;;  %239 = vmatprep.subr.mxu1 %v101_v42  ;;  %v74_v1 = vld [vmem:[#allocation7] sm:$0xff]  ;;  %v146_v2 = vld [vmem:[#allocation4 + $0x10] sm:$0xff]  ;;  %v147_v11 = vld [vmem:[#allocation4 + $0x18] sm:$0xff] }
  0x49   :  { %169 = vmatpush1.msra.mxu0 %v98_v43  ;;  %240 = vmatpush1.msra.mxu1 %v100_v44  ;;  %v144_v14 = vld [vmem:[#allocation4] sm:$0xff]  ;;  %v76_v21 = vld [vmem:[#allocation9] sm:$0xff] }
  0x4a   :  { %170 = vmatprep.subr.mxu0 %v95_v45  ;;  %241 = vmatprep.subr.mxu1 %v97_v46 }
  0x4b   :  { %171 = vmatpush1.msra.mxu0 %v94_v47  ;;  %242 = vmatpush1.msra.mxu1 %v96_v48 }
  0x4c   :  { %172 = vmatprep.subr.mxu0 %v91_v49  ;;  %243 = vmatprep.subr.mxu1 %v93_v50 }
  0x4d   :  { %173 = vmatpush1.msra.mxu0 %v90_v51  ;;  %244 = vmatpush1.msra.mxu1 %v92_v52 }
  0x4e   :  { %174 = vmatprep.subr.mxu0 %v87_v53  ;;  %245 = vmatprep.subr.mxu1 %v89_v54 }
  0x4f   :  { %175 = vmatpush1.msra.mxu0 %v86_v55  ;;  %246 = vmatpush1.msra.mxu1 %v88_v56 }
  0x50   :  { %176 = vmatprep.subr.mxu0 %v83_v57  ;;  %247 = vmatprep.subr.mxu1 %v85_v58 }
  0x51   :  { %177 = vmatpush1.msra.mxu0 %v82_v59  ;;  %248 = vmatpush1.msra.mxu1 %v84_v60 }
  0x52   :  { %178 = vmatprep.subr.mxu0 %v79_v61  ;;  %249 = vmatprep.subr.mxu1 %v81_v62 }
  0x53   :  { %179 = vmatpush1.msra.mxu0 %v78_v63  ;;  %250 = vmatpush1.msra.mxu1 %v80_v0 }
  0x54   :  { %213 = vmatmul.mubr.f32.vlgmr.msra.gmra.mxu0 %v74_v1  ;;  %284 = vmatmul.mubr.f32.vlgmr.msra.gmra.mxu1 %v74_v1 }
 0x114   :  { %v214_v3 = vpop.f32.mrf.mxu0  ;;  %v285_v4 = vpop.f32.mrf.mxu1 }
 0x115   :  { %v292_v6 = vadd.f32 %v285_v4, %v146_v2  ;;  %v290_v17 = vadd.f32 %v214_v3, %v144_v14 }
 0x116   :  { %v216_v7 = vpop.f32.mrf.mxu0  ;;  %v287_v12 = vpop.f32.mrf.mxu1 }
 0x117   :  { %v353_v8 = vmul.f32 -1.442695, %v292_v6  ;;  %v291_v9 = vadd.f32 %v216_v7, %v145_v5  ;;  %v293_v13 = vadd.f32 %v287_v12, %v147_v11 }
 0x119   :  { %365 = vpow2.f32 %v353_v8  ;;  %v354_v10 = vmul.f32 -1.442695, %v291_v9  ;;  %v355_v15 = vmul.f32 -1.442695, %v293_v13 }
 0x11b   :  { %367 = vpow2.f32 %v354_v10 }
 0x11c   :  { %369 = vpow2.f32 %v355_v15 }
 0x126   :  { %v366_v16 = vpop.eup %365 }
 0x127   :  { %v297_v18 = vadd.f32 1.0, %v366_v16 }
 0x128   :  { %v368_v19 = vpop.eup %367 }
 0x129   :  { %371 = vrcp.f32 %v297_v18  ;;  %v305_v20 = vadd.f32 1.0, %v368_v19  ;;  %v370_v22 = vpop.eup %369 }
 0x12a   :  { %373 = vtanh.f32 %v290_v17  ;;  %v314_v27 = vadd.f32 1.0, %v370_v22 }
 0x12b   :  { %375 = vrcp.f32 %v305_v20 }
 0x12c   :  { %377 = vrcp.f32 %v314_v27 }
 0x136   :  { %v372_v23 = vpop.eup %371 }
 0x137   :  { %v374_v24 = vpop.eup %373  ;;  %v300_v25 = vmul.f32 %v372_v23, %v76_v21 }
 0x138   :  { %v376_v26 = vpop.eup %375 }
 0x139   :  { %v308_v28 = vmul.f32 %v376_v26, %v374_v24 }
 0x13b   :  { %v309_v29 = vadd.f32 %v308_v28, %v300_v25 }
 0x13d   :  { %379 = vtanh.f32 %v309_v29  ;;  %319 = vst [vmem:[#allocation13] sm:$0xff] %v309_v29 }
 0x13e   :  { %472 = shalt.err (!%p469_p10)
}
 0x13f   :  { %341 = dma.vmem_to_hbm [thread:$0]  %s339_s3, 128, %s573_s5, [#allocation14]   ;;  %v378_v30 = vpop.eup %377 }
 0x140   :  { %s519_s16 = smov [#allocation12]  }
 0x141   :  { %s328_s17 = sshll.u32 %s519_s16, 4  ;;  %s329_s17 = int_to_ptr.vmem [resolvable:$true] %s328_s17 }
 0x142   :  { %s481_s18 = scalar_lea.vmem %s329_s17, 128  ;;  %p486_p12 = scmp.lt.s32.totalorder %s329_s17, %s329_s17 }
 0x143   :  { %p482_p11 = scmp.ne.s32.totalorder %s329_s17, %s481_s18  ;;  %p487_p13 = scmp.lt.s32.totalorder %s481_s18, %s481_s18 }
 0x145   :  { %p488_p0 = por %p487_p13, %p486_p12 }
 0x147   :  { %p489_p1 = pnand %p488_p0, %p482_p11 }
 0x14a   :  { %v380_v31 = vpop.eup %379 }
 0x14b   :  { %v317_v32 = vmul.f32 %v380_v31, %v378_v30 }
 0x14d   :  { %318 = vst [vmem:[#allocation12] sm:$0xff] %v317_v32 }
 0x14e   :  { %492 = shalt.err (!%p489_p1)
}
 0x14f   :  { %331 = dma.vmem_to_hbm [thread:$0]  %s329_s17, 128, %s572_s4, [#allocation6]  }
 0x150   :  { %507 = dma.done.wait [#allocation6], 128  }
 0x151   :  { %508 = vsyncadd [#allocation6], 4294967168 }
 0x152   :  { %509 = dma.done.wait [#allocation14], 128  }
 0x153   :  { %510 = vsyncadd [#allocation14], 4294967168 }
 0x154   :  { %348 = vsyncpa [#allocation5], 1 }
 0x155   :  { %349 = vsyncpa [#allocation8], 1 }
 0x156   :  { %350 = vsyncpa [#allocation11], 1 }
 0x157   :  { %351 = vsyncpa [#allocation6], 1 }
 0x158   :  { %352 = vsyncpa [#allocation14], 1 }

</bundles_post_ra>
